<compile_context>
chip_gen: v6e
topology: v6e:2x2x1
jax: 0.10.0
libtpu: 0.0.40
codegen_flags: <defaults>
</compile_context>

<pallas_src>
import functools

import jax
import jax.numpy as jnp
from jax.experimental import pallas as pl
from jax.experimental.pallas import tpu as pltpu


def _round_up(x, m):
    return (x + m - 1) // m * m


try:
    _info = pltpu.get_tpu_info()
    _VMEM_CAP = int(getattr(_info, "vmem_capacity_bytes", 0)) or 64 * 1024 * 1024
except Exception:  # interpret / non-TPU fallback
    _VMEM_CAP = 64 * 1024 * 1024


def _patch_embed_kernel(x_ref, w_ref, posb_ref, cls_ref, out_ref):
    """One batch-tile of the fused rearrange + Linear + cls/positions add.

    x_ref:    (TB, C, W, P)  input slab in native layout (free reshape of (B, C, L))
    w_ref:    (C, P, E)      Linear weight re-ordered: w[c, s2, :] = weight[:, s2*C + c]
    posb_ref: (W, E)         positions[1:] + bias      (f32, resident)
    cls_ref:  (1, E)         cls_token + positions[0]  (f32, resident)
    out_ref:  (TB, W+1, E)   final output rows for these batches (one aligned store)
    """
    TB, C, W, P = x_ref.shape
    E = out_ref.shape[-1]

    # sum_c  x[:, c] (TB, W, P)  @  w[c] (P, E)  ->  (TB, W, E), f32 MXU accumulation.
    acc = None
    for c in range(C):                                   # static unroll; C is small
        xc = x_ref[:, c]                                 # (TB, W, P)
        wc = jnp.broadcast_to(w_ref[c][None, :, :], (TB, P, E))
        contrib = jnp.einsum("bwp,bpe->bwe", xc, wc,
                             preferred_element_type=jnp.float32)
        acc = contrib if acc is None else acc + contrib

    body = acc + posb_ref[...][None, :, :]               # f32 add of positions+bias
    cls = jnp.broadcast_to(cls_ref[...][None, :, :], (TB, 1, E))
    out_ref[...] = jnp.concatenate([cls, body], axis=1).astype(out_ref.dtype)


def _pick_batch_tile(B, C, W, P, E, in_itemsize, out_itemsize, vmem_budget,
                     row_cap=2048):
    """Largest TB (divisor of B) whose padded, double-buffered footprint fits VMEM,
    preferring >=2 (even) grid tiles so v7x can shard batch tiles across its 2 TCs."""

    def footprint(tb):
        x_b = 2 * tb * C * _round_up(W, 8) * _round_up(P, 128) * in_itemsize
        out_b = 2 * tb * _round_up(W + 1, 8) * _round_up(E, 128) * out_itemsize
        w_b = 2 * C * _round_up(P, 8) * _round_up(E, 128) * in_itemsize
        tab_b = 2 * (_round_up(W, 8) + 8) * _round_up(E, 128) * 4
        return x_b + out_b + w_b + tab_b

    divisors = [d for d in range(1, B + 1) if B % d == 0]
    feasible = [d for d in divisors if footprint(d) <= vmem_budget] or [1]

    def score(d):
        grid = B // d
        return (
            (grid >= 2) or B < 2,       # need >=2 tiles for v7x TC sharding
            d * W <= row_cap,           # per-step overhead is amortized well below ~2k rows
            (grid % 2 == 0) or B < 2,   # even tile count splits evenly across 2 TCs
            d,                          # then: biggest tile that fits
        )

    tb = max(feasible, key=score)
    return tb, footprint(tb)


@functools.partial(jax.jit, static_argnums=(5,))
def patch_embedding_linear(x, weight, bias, cls_token, positions, patch_size):
    """x: (B, C, L). weight: (E, K=patch_size*C) as in torch.nn.Linear.
    Returns (B, W+1, E) with W = L // patch_size; output dtype follows x."""
    B, C, L = x.shape
    P = patch_size
    assert L % P == 0
    W = L // P
    E, K = weight.shape
    assert K == P * C
    out_dtype = x.dtype

    # Free reshape (metadata only, no HBM pass): the kernel reads x in native layout.
    x4 = x.reshape(B, C, W, P)

    # Weight re-ordered so the kernel contracts per channel without any transpose:
    # wr[c, s2, e] = weight[e, s2*C + c].   (tiny, one-time)
    wr = weight.T.reshape(P, C, E).transpose(1, 0, 2).astype(x.dtype)

    # Tiny resident tables, kept in f32 so the add happens on the f32 accumulator.
    posb = (positions[1:, :] + bias[None, :]).astype(jnp.float32)               # (W, E)
    cls_row = (cls_token.reshape(1, E) + positions[0][None, :]).astype(jnp.float32)

    in_itemsize = jnp.dtype(x.dtype).itemsize
    out_itemsize = jnp.dtype(out_dtype).itemsize
    vmem_budget = _VMEM_CAP // 2     # per-generation: ~32 MiB on v7x, ~64 MiB on v5e/v6e
    TB, fp_bytes = _pick_batch_tile(B, C, W, P, E, in_itemsize, out_itemsize, vmem_budget)
    num_tiles = B // TB
    # TODO(synk): if a single batch ever exceeds the VMEM budget (huge C*L or W*E),
    # additionally split W within a batch instead of relying on the TB=1 fallback.

    vmem_limit = int(min(max(fp_bytes + (4 << 20), 16 << 20), int(_VMEM_CAP * 0.9)))

    stream_kwargs = {}
    if num_tiles >= 4:
        # Long grid + tiny per-tile compute: deepen buffering so DMA latency stays hidden.
        stream_kwargs["pipeline_mode"] = pl.Buffered(3)

    cost = pl.CostEstimate(
        flops=2 * B * W * K * E,
        transcendentals=0,
        bytes_accessed=(B * C * L * in_itemsize + C * P * E * in_itemsize
                        + (W + 1) * E * 4 + B * (W + 1) * E * out_itemsize),
    )

    return pl.pallas_call(
        _patch_embed_kernel,
        out_shape=jax.ShapeDtypeStruct((B, W + 1, E), out_dtype),
        grid_spec=pltpu.PrefetchScalarGridSpec(
            num_scalar_prefetch=0,
            grid=(num_tiles,),
            in_specs=[
                pl.BlockSpec((TB, C, W, P), lambda i: (i, 0, 0, 0), **stream_kwargs),
                pl.BlockSpec((C, P, E), lambda i: (0, 0, 0)),      # resident weight
                pl.BlockSpec((W, E), lambda i: (0, 0)),            # resident pos+bias
                pl.BlockSpec((1, E), lambda i: (0, 0)),            # resident cls row
            ],
            out_specs=pl.BlockSpec((TB, W + 1, E), lambda i: (i, 0, 0), **stream_kwargs),
        ),
        compiler_params=pltpu.CompilerParams(
            dimension_semantics=("parallel",),     # shard batch tiles across TCs (v7x)
            vmem_limit_bytes=vmem_limit,
        ),
        cost_estimate=cost,
    )(x4, wr, posb, cls_row)


def reference(x, weight, bias, cls_token, positions, patch_size):
    B, C, L = x.shape
    W = L // patch_size
    patches = x.reshape(B, C, W, patch_size).transpose(0, 2, 3, 1).reshape(B, W, -1)
    proj = patches @ weight.T + bias
    cls = jnp.broadcast_to(cls_token.reshape(1, 1, -1), (B, 1, weight.shape[0]))
    out = jnp.concatenate([cls, proj], axis=1)
    return out + positions[None, :, :]


if __name__ == "__main__":
    jax.config.update("jax_default_matmul_precision", "highest")

    # Small shapes consistent with the module.
    B, C, L = 2, 4, 16          # batch, in_channels, seq_length
    patch_size = 4
    E = 32                      # emb_size
    W = L // patch_size
    K = patch_size * C
    n_pos = W + 1               # seq_length // patch_size + 1

    key = jax.random.PRNGKey(0)
    kx, kw, kb, kc, kp = jax.random.split(key, 5)

    x = jax.random.normal(kx, (B, C, L), dtype=jnp.float32)
    weight = jax.random.normal(kw, (E, K), dtype=jnp.float32) * (1.0 / jnp.sqrt(K))
    bias = jax.random.normal(kb, (E,), dtype=jnp.float32) * 0.01
    cls_token = jax.random.normal(kc, (1, 1, E), dtype=jnp.float32)
    positions = jax.random.normal(kp, (n_pos, E), dtype=jnp.float32)

    ref = reference(x, weight, bias, cls_token, positions, patch_size)

    # f32 path: strict numerical check against the reference.
    out = patch_embedding_linear(x, weight, bias, cls_token, positions, patch_size)
    out = jax.block_until_ready(out)
    assert out.shape == (B, W + 1, E)
    assert jnp.allclose(out, ref, atol=1e-4, rtol=1e-4), float(jnp.max(jnp.abs(out - ref)))

    # bf16 input path (halves HBM read traffic on this bandwidth-bound op); f32 MXU
    # accumulation and f32 positions/bias add, so only input-rounding error remains.
    out_bf16 = patch_embedding_linear(
        x.astype(jnp.bfloat16), weight.astype(jnp.bfloat16), bias, cls_token,
        positions, patch_size)
    out_bf16 = jax.block_until_ready(out_bf16)
    assert out_bf16.dtype == jnp.bfloat16
    assert jnp.allclose(out_bf16.astype(jnp.float32), ref, atol=5e-2, rtol=5e-2)

    print("KERNEL_OK")
</pallas_src>

<mosaic_0001>
module attributes {stable_mosaic.version = 11 : i64} {
  func.func @_patch_embed_kernel(%arg0: i32, %arg1: memref<1x4x4x4xf32, #tpu.memory_space<vmem>>, %arg2: memref<4x4x32xf32, #tpu.memory_space<vmem>>, %arg3: memref<4x32xf32, #tpu.memory_space<vmem>>, %arg4: memref<1x32xf32, #tpu.memory_space<vmem>>, %arg5: memref<1x5x32xf32, #tpu.memory_space<vmem>>) attributes {dimension_semantics = [#tpu.dimension_semantics<parallel>], iteration_bounds = array<i64: 2>, scalar_prefetch = 0 : i64, scratch_operands = 0 : i64, tpu.core_type = #tpu.core_type<tc>, window_params = [{transform_indices = @transform_0, window_bounds = array<i64: 1, 4, 4, 4>}, {pipeline_mode = #tpu.pipeline_mode<synchronous>, transform_indices = @transform_1, window_bounds = array<i64: 4, 4, 32>}, {pipeline_mode = #tpu.pipeline_mode<synchronous>, transform_indices = @transform_2, window_bounds = array<i64: 4, 32>}, {pipeline_mode = #tpu.pipeline_mode<synchronous>, transform_indices = @transform_3, window_bounds = array<i64: 1, 32>}, {transform_indices = @transform_4, window_bounds = array<i64: 1, 5, 32>}]} {
    %c0 = arith.constant 0 : index
    %c0_0 = arith.constant 0 : index
    %c0_1 = arith.constant 0 : index
    %c0_2 = arith.constant 0 : index
    %0 = vector.load %arg1[%c0, %c0_0, %c0_1, %c0_2] : memref<1x4x4x4xf32, #tpu.memory_space<vmem>>, vector<1x1x4x4xf32>
    %1 = vector.shape_cast %0 : vector<1x1x4x4xf32> to vector<1x4x4xf32>
    %c0_3 = arith.constant 0 : index
    %c0_4 = arith.constant 0 : index
    %c0_5 = arith.constant 0 : index
    %2 = vector.load %arg2[%c0_3, %c0_4, %c0_5] : memref<4x4x32xf32, #tpu.memory_space<vmem>>, vector<1x4x32xf32>
    %3 = vector.shape_cast %2 : vector<1x4x32xf32> to vector<4x32xf32>
    %4 = vector.shape_cast %3 : vector<4x32xf32> to vector<1x4x32xf32>
    "tpu.trace_start"() <{level = 10 : i32, message = "bwp,bpe->bwe"}> : () -> ()
    %cst = arith.constant dense<0.000000e+00> : vector<1x4x32xf32>
    %5 = tpu.matmul %1, %4, %cst {dimension_numbers = #tpu.dot_dimension_numbers<[2], [1], [1], [2], [0, 0, 0, 1, 1, 2], [0], [0]>, precision = #tpu.contract_precision<fp32>} : vector<1x4x4xf32>, vector<1x4x32xf32>, vector<1x4x32xf32> -> vector<1x4x32xf32>
    "tpu.trace_stop"() : () -> ()
    %c0_6 = arith.constant 0 : index
    %c1 = arith.constant 1 : index
    %c0_7 = arith.constant 0 : index
    %c0_8 = arith.constant 0 : index
    %6 = vector.load %arg1[%c0_6, %c1, %c0_7, %c0_8] : memref<1x4x4x4xf32, #tpu.memory_space<vmem>>, vector<1x1x4x4xf32>
    %7 = vector.shape_cast %6 : vector<1x1x4x4xf32> to vector<1x4x4xf32>
    %c1_9 = arith.constant 1 : index
    %c0_10 = arith.constant 0 : index
    %c0_11 = arith.constant 0 : index
    %8 = vector.load %arg2[%c1_9, %c0_10, %c0_11] : memref<4x4x32xf32, #tpu.memory_space<vmem>>, vector<1x4x32xf32>
    %9 = vector.shape_cast %8 : vector<1x4x32xf32> to vector<4x32xf32>
    %10 = vector.shape_cast %9 : vector<4x32xf32> to vector<1x4x32xf32>
    "tpu.trace_start"() <{level = 10 : i32, message = "bwp,bpe->bwe"}> : () -> ()
    %cst_12 = arith.constant dense<0.000000e+00> : vector<1x4x32xf32>
    %11 = tpu.matmul %7, %10, %cst_12 {dimension_numbers = #tpu.dot_dimension_numbers<[2], [1], [1], [2], [0, 0, 0, 1, 1, 2], [0], [0]>, precision = #tpu.contract_precision<fp32>} : vector<1x4x4xf32>, vector<1x4x32xf32>, vector<1x4x32xf32> -> vector<1x4x32xf32>
    "tpu.trace_stop"() : () -> ()
    %12 = arith.addf %5, %11 : vector<1x4x32xf32>
    %c0_13 = arith.constant 0 : index
    %c2 = arith.constant 2 : index
    %c0_14 = arith.constant 0 : index
    %c0_15 = arith.constant 0 : index
    %13 = vector.load %arg1[%c0_13, %c2, %c0_14, %c0_15] : memref<1x4x4x4xf32, #tpu.memory_space<vmem>>, vector<1x1x4x4xf32>
    %14 = vector.shape_cast %13 : vector<1x1x4x4xf32> to vector<1x4x4xf32>
    %c2_16 = arith.constant 2 : index
    %c0_17 = arith.constant 0 : index
    %c0_18 = arith.constant 0 : index
    %15 = vector.load %arg2[%c2_16, %c0_17, %c0_18] : memref<4x4x32xf32, #tpu.memory_space<vmem>>, vector<1x4x32xf32>
    %16 = vector.shape_cast %15 : vector<1x4x32xf32> to vector<4x32xf32>
    %17 = vector.shape_cast %16 : vector<4x32xf32> to vector<1x4x32xf32>
    "tpu.trace_start"() <{level = 10 : i32, message = "bwp,bpe->bwe"}> : () -> ()
    %cst_19 = arith.constant dense<0.000000e+00> : vector<1x4x32xf32>
    %18 = tpu.matmul %14, %17, %cst_19 {dimension_numbers = #tpu.dot_dimension_numbers<[2], [1], [1], [2], [0, 0, 0, 1, 1, 2], [0], [0]>, precision = #tpu.contract_precision<fp32>} : vector<1x4x4xf32>, vector<1x4x32xf32>, vector<1x4x32xf32> -> vector<1x4x32xf32>
    "tpu.trace_stop"() : () -> ()
    %19 = arith.addf %12, %18 : vector<1x4x32xf32>
    %c0_20 = arith.constant 0 : index
    %c3 = arith.constant 3 : index
    %c0_21 = arith.constant 0 : index
    %c0_22 = arith.constant 0 : index
    %20 = vector.load %arg1[%c0_20, %c3, %c0_21, %c0_22] : memref<1x4x4x4xf32, #tpu.memory_space<vmem>>, vector<1x1x4x4xf32>
    %21 = vector.shape_cast %20 : vector<1x1x4x4xf32> to vector<1x4x4xf32>
    %c3_23 = arith.constant 3 : index
    %c0_24 = arith.constant 0 : index
    %c0_25 = arith.constant 0 : index
    %22 = vector.load %arg2[%c3_23, %c0_24, %c0_25] : memref<4x4x32xf32, #tpu.memory_space<vmem>>, vector<1x4x32xf32>
    %23 = vector.shape_cast %22 : vector<1x4x32xf32> to vector<4x32xf32>
    %24 = vector.shape_cast %23 : vector<4x32xf32> to vector<1x4x32xf32>
    "tpu.trace_start"() <{level = 10 : i32, message = "bwp,bpe->bwe"}> : () -> ()
    %cst_26 = arith.constant dense<0.000000e+00> : vector<1x4x32xf32>
    %25 = tpu.matmul %21, %24, %cst_26 {dimension_numbers = #tpu.dot_dimension_numbers<[2], [1], [1], [2], [0, 0, 0, 1, 1, 2], [0], [0]>, precision = #tpu.contract_precision<fp32>} : vector<1x4x4xf32>, vector<1x4x32xf32>, vector<1x4x32xf32> -> vector<1x4x32xf32>
    "tpu.trace_stop"() : () -> ()
    %26 = arith.addf %19, %25 : vector<1x4x32xf32>
    %c0_27 = arith.constant 0 : index
    %c0_28 = arith.constant 0 : index
    %27 = vector.load %arg3[%c0_27, %c0_28] : memref<4x32xf32, #tpu.memory_space<vmem>>, vector<4x32xf32>
    %28 = vector.shape_cast %27 : vector<4x32xf32> to vector<1x4x32xf32>
    %29 = arith.addf %26, %28 : vector<1x4x32xf32>
    %c0_29 = arith.constant 0 : index
    %c0_30 = arith.constant 0 : index
    %30 = vector.load %arg4[%c0_29, %c0_30] : memref<1x32xf32, #tpu.memory_space<vmem>>, vector<1x32xf32>
    %31 = vector.shape_cast %30 : vector<1x32xf32> to vector<1x1x32xf32>
    %32 = tpu.concatenate %31, %29 in 1 : vector<1x1x32xf32>, vector<1x4x32xf32> -> vector<1x5x32xf32>
    %c0_31 = arith.constant 0 : index
    %c0_32 = arith.constant 0 : index
    %c0_33 = arith.constant 0 : index
    %33 = vector.load %arg5[%c0_31, %c0_32, %c0_33] : memref<1x5x32xf32, #tpu.memory_space<vmem>>, vector<1x5x32xf32>
    tpu.vector_store %arg5[%c0_31, %c0_32, %c0_33], %32 {strides = array<i32>} : memref<1x5x32xf32, #tpu.memory_space<vmem>>, vector<1x5x32xf32>,
    return
  }
  func.func @transform_0(%arg0: i32) -> (i32, i32, i32, i32) {
    %c0_i32 = arith.constant 0 : i32
    %c0_i32_0 = arith.constant 0 : i32
    %c0_i32_1 = arith.constant 0 : i32
    %c0_i32_2 = arith.constant 0 : i32
    return %arg0, %c0_i32, %c0_i32_0, %c0_i32_1 : i32, i32, i32, i32
  }
  func.func @transform_1(%arg0: i32) -> (i32, i32, i32) {
    %c0_i32 = arith.constant 0 : i32
    %c0_i32_0 = arith.constant 0 : i32
    %c0_i32_1 = arith.constant 0 : i32
    %c0_i32_2 = arith.constant 0 : i32
    return %c0_i32, %c0_i32_0, %c0_i32_1 : i32, i32, i32
  }
  func.func @transform_2(%arg0: i32) -> (i32, i32) {
    %c0_i32 = arith.constant 0 : i32
    %c0_i32_0 = arith.constant 0 : i32
    %c0_i32_1 = arith.constant 0 : i32
    return %c0_i32, %c0_i32_0 : i32, i32
  }
  func.func @transform_3(%arg0: i32) -> (i32, i32) {
    %c0_i32 = arith.constant 0 : i32
    %c0_i32_0 = arith.constant 0 : i32
    %c0_i32_1 = arith.constant 0 : i32
    return %c0_i32, %c0_i32_0 : i32, i32
  }
  func.func @transform_4(%arg0: i32) -> (i32, i32, i32) {
    %c0_i32 = arith.constant 0 : i32
    %c0_i32_0 = arith.constant 0 : i32
    %c0_i32_1 = arith.constant 0 : i32
    return %arg0, %c0_i32, %c0_i32_0 : i32, i32, i32
  }
}

</mosaic_0001>

<bundles_post_ra>
// kernel: patch_embedding_linear.1
= control target key start
LH: loop header
LB: loop body
LE: loop exit
PB: predicated region body
PF: predicated region fallthrough
CT: control target
= control target key end

     0   :  { %s2315_s15 = smov 0   ;;  %s2493_s0 = inlined_call_operand.vmem [shape: f32[2,4,4,4], index: 0, kind: input, shape index: {}]   ;;  %s2494_s1 = inlined_call_operand.vmem [shape: f32[4,4,32], index: 1, kind: input, shape index: {}]   ;;  %s2495_s2 = inlined_call_operand.vmem [shape: f32[4,32], index: 2, kind: input, shape index: {}]   ;;  %s2496_s3 = inlined_call_operand.vmem [shape: f32[1,32], index: 3, kind: input, shape index: {}]   ;;  %s2497_s4 = inlined_call_operand.vmem [shape: f32[2,5,32], index: 4, kind: output, shape index: {}]  }
   0x1 LB: > { %s2085_s16 = sadd.s32 4294967295, %s2286_s15   ;;  %p2089_p0 = scmp.ge.s32.totalorder %s2286_s15, 1  ;;  %s2286_s15 = sphi %s2315_s15, %s14_s15  }
   0x2   : > { %p162_p1 = scmp.lt.s32.totalorder %s2286_s15, 3 }
   0x4   : > { %p163_p2 = pnand %p2089_p0, %p162_p1 }
   0x5   : > { %p187_p3 = scmp.lt.s32.totalorder (!%p163_p2), %s2085_s16, 1 }
   0x6   : > { %166 = sbr.rel (%p163_p2) target bundleno = 276 (0x114), region = 36 }
   0xb   : > { %v2094_v0 = vld [vmem:[%s2494_s1 + $0x4] sm:$0xf]  ;;  %vm206_vm0 = vcmask 1043456   ;;  %v2288_v1 = vmov 0.0   ;;  %v197_v3 = vld [vmem:[%s2494_s1] sm:$0xf] }
   0xc   : > { %2150 = vmatprep.subr.mxu0 %v2288_v1  ;;  %v208_v2 = vsel %vm206_vm0, %v2094_v0, 0  ;;  %2155 = vmatprep.subr.mxu1 %v2288_v1  ;;  %vm2289_vm1 = vmmov 0   ;;  %s2499_s16 = smov (!%p187_p3, %s2085_s16), 1  ;;  %v660_v5 = vsel %vm206_vm0, %v197_v3, 0  ;;  %vm202_vm2 = vcmask 31744  }
   0xd   : > { %v241_v4 = vand.u32 4294901760, %v208_v2  ;;  %2152 = vmatprep.mubr.msk.f32.mxu0 %vm2289_vm1, %v2288_v1  ;;  %2157 = vmatprep.mubr.msk.f32.mxu1 %vm2289_vm1, %v2288_v1  ;;  %v2339_v6 = vand.u32 4294901760, %v660_v5  ;;  %s2101_s21 = sshll.u32 %s2499_s16, 4  ;;  %v2096_v16 = vld [vmem:[%s2494_s1 + $0x8] sm:$0xf]  ;;  %s2092_s5 = sshll.u32 %s2499_s16, 3 }
   0xe   : > { %s2346_s24 = scalar_lea.vmem %s2493_s0, %s2101_s21  ;;  %v1116_v21 = vsel %vm206_vm0, %v2096_v16, 0  ;;  %v2098_v33 = vld [vmem:[%s2494_s1 + $0xc] sm:$0xf]  ;;  %vm2028_vm3 = vcmask 1040384   ;;  %s195_s10 = scalar_lea.vmem %s2497_s4, %s2092_s5  ;;  %vm2030_vm4 = vcmask 258048  }
   0xf   : > { %2151 = vmatpush3.msra.mxu0 %v241_v4  ;;  %v318_v7 = vsub.f32 %v208_v2, %v241_v4  ;;  %v2093_v9 = vld [vmem:[%s2346_s24 + $0x4] sm:$0xf]  ;;  %v2350_v10 = vsub.f32 %v660_v5, %v2339_v6  ;;  %v196_v11 = vld [vmem:[%s2346_s24] sm:$0xf]  ;;  %v2369_v26 = vand.u32 4294901760, %v1116_v21  ;;  %v1573_v37 = vsel %vm206_vm0, %v2098_v33, 0 }
  0x10   : > { %2160 = vmatprep.subr.mxu0 %v2288_v1  ;;  %v204_v12 = vsel %vm202_vm2, %v2093_v9, 0  ;;  %v657_v13 = vsel %vm202_vm2, %v196_v11, 0  ;;  %v2095_v28 = vld [vmem:[%s2346_s24 + $0x8] sm:$0xf]  ;;  %v2402_v41 = vand.u32 4294901760, %v1573_v37 }
  0x11   : > { %v319_v8 = vand.u32 4294901760, %v318_v7  ;;  %v276_v15 = vand.u32 4294901760, %v204_v12  ;;  %v771_v19 = vand.u32 4294901760, %v2350_v10  ;;  %v2359_v20 = vand.u32 4294901760, %v657_v13  ;;  %v2097_v42 = vld [vmem:[%s2346_s24 + $0xc] sm:$0xf] }
  0x12   : > { %v2374_v31 = vsub.f32 %v1116_v21, %v2369_v26  ;;  %v1113_v32 = vsel %vm202_vm2, %v2095_v28, 0  ;;  %v2414_v45 = vsub.f32 %v1573_v37, %v2402_v41  ;;  %v1570_v46 = vsel %vm202_vm2, %v2097_v42, 0 }
  0x13   : > { %v320_v14 = vsub.f32 %v318_v7, %v319_v8  ;;  %v277_v18 = vsub.f32 %v204_v12, %v276_v15  ;;  %v772_v24 = vsub.f32 %v2350_v10, %v771_v19  ;;  %v729_v25 = vsub.f32 %v657_v13, %v2359_v20 }
  0x14   : > { %v1227_v35 = vand.u32 4294901760, %v2374_v31  ;;  %v2387_v36 = vand.u32 4294901760, %v1113_v32  ;;  %v1684_v48 = vand.u32 4294901760, %v2414_v45  ;;  %v1641_v49 = vand.u32 4294901760, %v1570_v46 }
  0x15   : > { %v321_v17 = vand.u32 4294901760, %v320_v14  ;;  %v278_v22 = vand.u32 4294901760, %v277_v18  ;;  %v773_v29 = vand.u32 4294901760, %v772_v24  ;;  %v730_v30 = vand.u32 4294901760, %v729_v25 }
  0x16   : > { %v1228_v39 = vsub.f32 %v2374_v31, %v1227_v35  ;;  %v1185_v40 = vsub.f32 %v1113_v32, %v2387_v36  ;;  %v1685_v51 = vsub.f32 %v2414_v45, %v1684_v48  ;;  %v1642_v52 = vsub.f32 %v1570_v46, %v1641_v49 }
  0x17   : > { %2156 = vmatpush3.msra.mxu1 %v321_v17  ;;  %v279_v23 = vsub.f32 %v277_v18, %v278_v22  ;;  %v731_v34 = vsub.f32 %v729_v25, %v730_v30 }
  0x18   : > { %2158 = vmatmul.mubr.f32.vlgmr.msra.gmra.mxu1 %v276_v15  ;;  %2165 = vmatprep.subr.mxu1 %v2288_v1  ;;  %v1229_v43 = vand.u32 4294901760, %v1228_v39  ;;  %v1186_v44 = vand.u32 4294901760, %v1185_v40  ;;  %v1686_v53 = vand.u32 4294901760, %v1685_v51  ;;  %v1643_v54 = vand.u32 4294901760, %v1642_v52 }
  0x19   : > { %2166 = vmatpush3.msra.mxu1 %v241_v4  ;;  %2167 = vmatprep.mubr.msk.f32.mxu1 %vm2289_vm1, %v2288_v1  ;;  %v280_v27 = vand.u32 4294901760, %v279_v23  ;;  %v732_v38 = vand.u32 4294901760, %v731_v34 }
  0x1a   : > { %2175 = vmatprep.subr.mxu1 %v2288_v1  ;;  %v1187_v47 = vsub.f32 %v1185_v40, %v1186_v44  ;;  %v1644_v55 = vsub.f32 %v1642_v52, %v1643_v54 }
  0x1b   : > { %2153 = vmatmul.mubr.f32.vlgmr.msra.gmra.mxu0 %v280_v27 }
  0x1c   : > { %2168 = vmatmul.mubr.f32.vlgmr.msra.gmra.mxu1 %v278_v22  ;;  %2161 = vmatpush3.msra.mxu0 %v318_v7  ;;  %v1188_v50 = vand.u32 4294901760, %v1187_v47  ;;  %v1645_v56 = vand.u32 4294901760, %v1644_v55 }
  0x1d   : > { %2176 = vmatpush3.msra.mxu1 %v241_v4  ;;  %2162 = vmatprep.mubr.msk.f32.mxu0 %vm2289_vm1, %v2288_v1 }
  0x1e   : > { %2170 = vmatprep.subr.mxu0 %v2288_v1  ;;  %2177 = vmatprep.mubr.msk.f32.mxu1 %vm2289_vm1, %v2288_v1 }
  0x1f   : > { %2185 = vmatprep.subr.mxu1 %v2288_v1  ;;  %2163 = vmatmul.mubr.f32.vlgmr.msra.gmra.mxu0 %v277_v18 }
  0x20   : > { %2178 = vmatmul.mubr.f32.vlgmr.msra.gmra.mxu1 %v276_v15  ;;  %2171 = vmatpush3.msra.mxu0 %v319_v8 }
  0x21   : > { %2186 = vmatpush3.msra.mxu1 %v773_v29  ;;  %2172 = vmatprep.mubr.msk.f32.mxu0 %vm2289_vm1, %v2288_v1 }
  0x22   : > { %2180 = vmatprep.subr.mxu0 %v2288_v1  ;;  %2187 = vmatprep.mubr.msk.f32.mxu1 %vm2289_vm1, %v2288_v1 }
  0x23   : > { %2195 = vmatprep.subr.mxu1 %v2288_v1  ;;  %2173 = vmatmul.mubr.f32.vlgmr.msra.gmra.mxu0 %v276_v15 }
  0x24   : > { %2188 = vmatmul.mubr.f32.vlgmr.msra.gmra.mxu1 %v2359_v20  ;;  %2181 = vmatpush3.msra.mxu0 %v2339_v6 }
  0x25   : > { %2196 = vmatpush3.msra.mxu1 %v2339_v6  ;;  %2182 = vmatprep.mubr.msk.f32.mxu0 %vm2289_vm1, %v2288_v1 }
  0x26   : > { %2190 = vmatprep.subr.mxu0 %v2288_v1  ;;  %2197 = vmatprep.mubr.msk.f32.mxu1 %vm2289_vm1, %v2288_v1 }
  0x27   : > { %2205 = vmatprep.subr.mxu1 %v2288_v1  ;;  %2183 = vmatmul.mubr.f32.vlgmr.msra.gmra.mxu0 %v732_v38 }
  0x28   : > { %2198 = vmatmul.mubr.f32.vlgmr.msra.gmra.mxu1 %v730_v30  ;;  %2191 = vmatpush3.msra.mxu0 %v2350_v10 }
  0x29   : > { %2206 = vmatpush3.msra.mxu1 %v2339_v6  ;;  %2192 = vmatprep.mubr.msk.f32.mxu0 %vm2289_vm1, %v2288_v1 }
  0x2a   : > { %2200 = vmatprep.subr.mxu0 %v2288_v1  ;;  %2207 = vmatprep.mubr.msk.f32.mxu1 %vm2289_vm1, %v2288_v1 }
  0x2b   : > { %2215 = vmatprep.subr.mxu1 %v2288_v1  ;;  %2193 = vmatmul.mubr.f32.vlgmr.msra.gmra.mxu0 %v729_v25 }
  0x2c   : > { %2208 = vmatmul.mubr.f32.vlgmr.msra.gmra.mxu1 %v2359_v20  ;;  %2201 = vmatpush3.msra.mxu0 %v771_v19 }
  0x2d   : > { %2216 = vmatpush3.msra.mxu1 %v1229_v43  ;;  %2202 = vmatprep.mubr.msk.f32.mxu0 %vm2289_vm1, %v2288_v1 }
  0x2e   : > { %2210 = vmatprep.subr.mxu0 %v2288_v1  ;;  %2217 = vmatprep.mubr.msk.f32.mxu1 %vm2289_vm1, %v2288_v1 }
  0x2f   : > { %2225 = vmatprep.subr.mxu1 %v2288_v1  ;;  %2203 = vmatmul.mubr.f32.vlgmr.msra.gmra.mxu0 %v2359_v20 }
  0x30   : > { %2218 = vmatmul.mubr.f32.vlgmr.msra.gmra.mxu1 %v2387_v36  ;;  %2211 = vmatpush3.msra.mxu0 %v2369_v26 }
  0x31   : > { %2226 = vmatpush3.msra.mxu1 %v2369_v26  ;;  %2212 = vmatprep.mubr.msk.f32.mxu0 %vm2289_vm1, %v2288_v1 }
  0x32   : > { %2220 = vmatprep.subr.mxu0 %v2288_v1  ;;  %2227 = vmatprep.mubr.msk.f32.mxu1 %vm2289_vm1, %v2288_v1 }
  0x33   : > { %2235 = vmatprep.subr.mxu1 %v2288_v1  ;;  %2213 = vmatmul.mubr.f32.vlgmr.msra.gmra.mxu0 %v1188_v50 }
  0x34   : > { %2228 = vmatmul.mubr.f32.vlgmr.msra.gmra.mxu1 %v1186_v44  ;;  %2221 = vmatpush3.msra.mxu0 %v2374_v31 }
  0x35   : > { %2236 = vmatpush3.msra.mxu1 %v2369_v26  ;;  %2222 = vmatprep.mubr.msk.f32.mxu0 %vm2289_vm1, %v2288_v1 }
  0x36   : > { %2230 = vmatprep.subr.mxu0 %v2288_v1  ;;  %2237 = vmatprep.mubr.msk.f32.mxu1 %vm2289_vm1, %v2288_v1 }
  0x37   : > { %2245 = vmatprep.subr.mxu1 %v2288_v1  ;;  %2223 = vmatmul.mubr.f32.vlgmr.msra.gmra.mxu0 %v1185_v40 }
  0x38   : > { %2238 = vmatmul.mubr.f32.vlgmr.msra.gmra.mxu1 %v2387_v36  ;;  %2231 = vmatpush3.msra.mxu0 %v1227_v35 }
  0x39   : > { %2246 = vmatpush3.msra.mxu1 %v1686_v53  ;;  %2232 = vmatprep.mubr.msk.f32.mxu0 %vm2289_vm1, %v2288_v1 }
  0x3a   : > { %2240 = vmatprep.subr.mxu0 %v2288_v1  ;;  %2247 = vmatprep.mubr.msk.f32.mxu1 %vm2289_vm1, %v2288_v1 }
  0x3b   : > { %2255 = vmatprep.subr.mxu1 %v2288_v1  ;;  %2233 = vmatmul.mubr.f32.vlgmr.msra.gmra.mxu0 %v2387_v36 }
  0x3c   : > { %2248 = vmatmul.mubr.f32.vlgmr.msra.gmra.mxu1 %v1641_v49  ;;  %2241 = vmatpush3.msra.mxu0 %v2402_v41 }
  0x3d   : > { %2256 = vmatpush3.msra.mxu1 %v2402_v41  ;;  %2242 = vmatprep.mubr.msk.f32.mxu0 %vm2289_vm1, %v2288_v1 }
  0x3e   : > { %2250 = vmatprep.subr.mxu0 %v2288_v1  ;;  %2257 = vmatprep.mubr.msk.f32.mxu1 %vm2289_vm1, %v2288_v1 }
  0x3f   : > { %2265 = vmatprep.subr.mxu1 %v2288_v1  ;;  %2243 = vmatmul.mubr.f32.vlgmr.msra.gmra.mxu0 %v1645_v56 }
  0x40   : > { %2258 = vmatmul.mubr.f32.vlgmr.msra.gmra.mxu1 %v1643_v54  ;;  %2251 = vmatpush3.msra.mxu0 %v2414_v45 }
  0x41   : > { %2266 = vmatpush3.msra.mxu1 %v2402_v41  ;;  %2252 = vmatprep.mubr.msk.f32.mxu0 %vm2289_vm1, %v2288_v1 }
  0x42   : > { %2260 = vmatprep.subr.mxu0 %v2288_v1  ;;  %2267 = vmatprep.mubr.msk.f32.mxu1 %vm2289_vm1, %v2288_v1 }
  0x43   : > { %2253 = vmatmul.mubr.f32.vlgmr.msra.gmra.mxu0 %v1642_v52 }
  0x44   : > { %2268 = vmatmul.mubr.f32.vlgmr.msra.gmra.mxu1 %v1641_v49  ;;  %2261 = vmatpush3.msra.mxu0 %v1684_v48 }
  0x45   : > { %2262 = vmatprep.mubr.msk.f32.mxu0 %vm2289_vm1, %v2288_v1 }
  0x47   : > { %2263 = vmatmul.mubr.f32.vlgmr.msra.gmra.mxu0 %v1641_v49 }
  0xd8   : > { %v358_v57 = vpop.f32.mrf.mxu1 }
  0xda   : > { %v2159_v58 = vpop.f32.mrf.mxu1 }
  0xdb   : > { %v282_v60 = vpop.f32.mrf.mxu0 }
  0xdc   : > { %v506_v59 = vpop.f32.mrf.mxu1  ;;  %v359_v4 = vadd.f32 %v358_v57, %v282_v60 }
  0xdd   : > { %v2154_v62 = vpop.f32.mrf.mxu0 }
  0xde   : > { %v2169_v61 = vpop.f32.mrf.mxu1 }
  0xdf   : > { %v432_v0 = vpop.f32.mrf.mxu0 }
  0xe0   : > { %v652_v63 = vpop.f32.mrf.mxu1  ;;  %v433_v7 = vadd.f32 %v432_v0, %v359_v4 }
  0xe1   : > { %v2164_v3 = vpop.f32.mrf.mxu0 }
  0xe2   : > { %v2179_v2 = vpop.f32.mrf.mxu1  ;;  %v507_v1 = vadd.f32 %v506_v59, %v433_v7  ;;  %v2024_v3 = vld [vmem:[%s2496_s3] sm:$0x1] }
  0xe3   : > { %v580_v6 = vpop.f32.mrf.mxu0 }
  0xe4   : > { %v810_v5 = vpop.f32.mrf.mxu1  ;;  %v581_v16 = vadd.f32 %v580_v6, %v507_v1 }
  0xe5   : > { %v2174_v9 = vpop.f32.mrf.mxu0 }
  0xe6   : > { %v2189_v8 = vpop.f32.mrf.mxu1  ;;  %v653_v21 = vadd.f32 %v652_v63, %v581_v16  ;;  %v2022_v63 = vld [vmem:[%s2495_s2] sm:$0xf] }
  0xe7   : > { %v734_v11 = vpop.f32.mrf.mxu0 }
  0xe8   : > { %v958_v10 = vpop.f32.mrf.mxu1  ;;  %v735_v26 = vadd.f32 %v734_v11, %v653_v21 }
  0xe9   : > { %v2184_v13 = vpop.f32.mrf.mxu0 }
  0xea   : > { %v2199_v12 = vpop.f32.mrf.mxu1  ;;  %v811_v31 = vadd.f32 %v810_v5, %v735_v26 }
  0xeb   : > { %v884_v15 = vpop.f32.mrf.mxu0 }
  0xec   : > { %v1104_v14 = vpop.f32.mrf.mxu1  ;;  %v885_v38 = vadd.f32 %v884_v15, %v811_v31 }
  0xed   : > { %v2194_v18 = vpop.f32.mrf.mxu0 }
  0xee   : > { %v2209_v17 = vpop.f32.mrf.mxu1  ;;  %v959_v44 = vadd.f32 %v958_v10, %v885_v38 }
  0xef   : > { %v1032_v20 = vpop.f32.mrf.mxu0 }
  0xf0   : > { %v1266_v19 = vpop.f32.mrf.mxu1  ;;  %v1033_v51 = vadd.f32 %v1032_v20, %v959_v44 }
  0xf1   : > { %v2204_v23 = vpop.f32.mrf.mxu0 }
  0xf2   : > { %v2219_v22 = vpop.f32.mrf.mxu1  ;;  %v1105_v58 = vadd.f32 %v1104_v14, %v1033_v51 }
  0xf3   : > { %v1190_v25 = vpop.f32.mrf.mxu0 }
  0xf4   : > { %v1414_v24 = vpop.f32.mrf.mxu1  ;;  %v1267_v32 = vadd.f32 %v1266_v19, %v1190_v25 }
  0xf5   : > { %v2214_v28 = vpop.f32.mrf.mxu0 }
  0xf6   : > { %v2229_v27 = vpop.f32.mrf.mxu1 }
  0xf7   : > { %v1340_v30 = vpop.f32.mrf.mxu0 }
  0xf8   : > { %v1560_v29 = vpop.f32.mrf.mxu1  ;;  %v1341_v35 = vadd.f32 %v1340_v30, %v1267_v32 }
  0xf9   : > { %v2224_v34 = vpop.f32.mrf.mxu0 }
  0xfa   : > { %v2239_v33 = vpop.f32.mrf.mxu1  ;;  %v1415_v41 = vadd.f32 %v1414_v24, %v1341_v35 }
  0xfb   : > { %v1488_v37 = vpop.f32.mrf.mxu0 }
  0xfc   : > { %v1723_v36 = vpop.f32.mrf.mxu1  ;;  %v1489_v47 = vadd.f32 %v1488_v37, %v1415_v41 }
  0xfd   : > { %v2234_v40 = vpop.f32.mrf.mxu0 }
  0xfe   : > { %v2249_v39 = vpop.f32.mrf.mxu1  ;;  %v1561_v55 = vadd.f32 %v1560_v29, %v1489_v47 }
  0xff   : > { %v1647_v43 = vpop.f32.mrf.mxu0 }
 0x100   : > { %v1871_v42 = vpop.f32.mrf.mxu1  ;;  %v1724_v48 = vadd.f32 %v1723_v36, %v1647_v43  ;;  %v1564_v61 = vadd.f32 %v1561_v55, %v1105_v58 }
 0x101   : > { %v2244_v46 = vpop.f32.mrf.mxu0 }
 0x102   : > { %v2259_v45 = vpop.f32.mrf.mxu1 }
 0x103   : > { %v1797_v50 = vpop.f32.mrf.mxu0 }
 0x104   : > { %v2017_v49 = vpop.f32.mrf.mxu1  ;;  %v1798_v52 = vadd.f32 %v1797_v50, %v1724_v48 }
 0x105   : > { %v2254_v54 = vpop.f32.mrf.mxu0 }
 0x106   : > { %v2269_v53 = vpop.f32.mrf.mxu1  ;;  %v1872_v56 = vadd.f32 %v1871_v42, %v1798_v52 }
 0x107   : > { %v1945_v57 = vpop.f32.mrf.mxu0 }
 0x108   : > { %v1946_v59 = vadd.f32 %v1945_v57, %v1872_v56 }
 0x109   : > { %v2264_v60 = vpop.f32.mrf.mxu0 }
 0x10a   : > { %v2018_v62 = vadd.f32 %v2017_v49, %v1946_v59 }
 0x10c   : > { %v2021_v0 = vadd.f32 %v2018_v62, %v1564_v61 }
 0x10e   : > { %v2023_v2 = vadd.f32 %v2022_v63, %v2021_v0 }
 0x110   : > { %v2026_v4 = vrot.slane %v2023_v2, 7 }
 0x112   : > { %v2029_v5 = vsel %vm2028_vm3, %v2024_v3, %v2026_v4 }
 0x113   : > { %2031 = vst.msk [vmem:[%s195_s10] sm:$0x1f] %vm2030_vm4, %v2029_v5 }
 0x114 PF: > { %s14_s15 = sadd.s32 1, %s2286_s15  }
 0x115   : > { %p11_p4 = scmp.ge.s32.totalorder %s14_s15, 4  }
 0x117   :  { %13 = sbr.rel (!%p11_p4) target bundleno = 1 (0x1), region = 72 }

</bundles_post_ra>
